<compile_context>
chip_gen: v6e
topology: v6e:2x2x1
jax: 0.10.0
libtpu: 0.0.40
codegen_flags: <defaults>
</compile_context>

<pallas_src>
import functools
import math

import numpy as np
import jax
import jax.numpy as jnp
from jax.experimental import pallas as pl
from jax.experimental.pallas import tpu as pltpu


# ----------------------------------------------------------------------------
# Config
# ----------------------------------------------------------------------------
CDT = jnp.bfloat16          # storage dtype for activations / matmul weights
ROW_BLOCK = 256             # row tile for the (B*T, C) kernels
VMEM_LIMIT = 32 * 1024 * 1024

_CompilerParams = getattr(pltpu, "CompilerParams",
                          getattr(pltpu, "TPUCompilerParams", None))


def _cparams(*semantics):
    if _CompilerParams is None:
        return None
    return _CompilerParams(dimension_semantics=tuple(semantics),
                           vmem_limit_bytes=VMEM_LIMIT)


# ----------------------------------------------------------------------------
# Fused linear kernel: [LN | BN+Swish] -> matmul -> [GLU | ReLU | Swish]
#                      -> [mask-mul] -> [residual add (scaled)]
# ----------------------------------------------------------------------------
def _fused_linear_kernel(*refs, act, has_ln, has_bn, glu, has_mul, has_res,
                         res_scale):
    refs = list(refs)
    o_ref = refs.pop()                      # single output, no scratch
    i = 0
    x = refs[i][...].astype(jnp.float32); i += 1

    if has_ln:
        g = refs[i][...].astype(jnp.float32)
        b = refs[i + 1][...].astype(jnp.float32)
        i += 2
        mu = jnp.mean(x, axis=-1, keepdims=True)
        var = jnp.mean(jnp.square(x - mu), axis=-1, keepdims=True)
        x = (x - mu) * jax.lax.rsqrt(var + 1e-5) * g + b

    if has_bn:
        mu_b = refs[i][...].astype(jnp.float32)
        inv_b = refs[i + 1][...].astype(jnp.float32)
        g_b = refs[i + 2][...].astype(jnp.float32)
        beta_b = refs[i + 3][...].astype(jnp.float32)
        i += 4
        x = (x - mu_b) * inv_b * g_b + beta_b
        x = x * jax.nn.sigmoid(x)           # Swish fused after BatchNorm

    w_ref = refs[i]; i += 1
    bias = refs[i][...].astype(jnp.float32); i += 1
    # bf16 MXU operands, f32 accumulation.
    y = jnp.dot(x.astype(w_ref.dtype), w_ref[...],
                preferred_element_type=jnp.float32) + bias

    if glu:
        half = y.shape[-1] // 2
        y = y[:, :half] * jax.nn.sigmoid(y[:, half:])
    if act == "relu":
        y = jnp.maximum(y, 0.0)
    elif act == "swish":
        y = y * jax.nn.sigmoid(y)

    if has_mul:
        y = y * refs[i][...].astype(jnp.float32); i += 1
    if has_res:
        y = refs[i][...].astype(jnp.float32) + res_scale * y; i += 1

    o_ref[...] = y.astype(o_ref.dtype)


def fused_linear(x2d, w, b, *, act="none", ln=None, bn=None, glu=False,
                 mul=None, residual=None, res_scale=1.0, out_dtype=None):
    n, cin = x2d.shape
    cout = w.shape[1]
    cout_eff = cout // 2 if glu else cout
    blk = n if n <= ROW_BLOCK else ROW_BLOCK
    grid = (pl.cdiv(n, blk),)

    def row_spec(c):
        return pl.BlockSpec((blk, c), lambda i: (i, 0))

    def bcast_spec(shape):
        return pl.BlockSpec(shape, lambda i: (0,) * len(shape))

    operands = [x2d]
    in_specs = [row_spec(cin)]
    if ln is not None:
        operands += list(ln)
        in_specs += [bcast_spec((1, cin)), bcast_spec((1, cin))]
    if bn is not None:
        operands += list(bn)
        in_specs += [bcast_spec((1, cin))] * 4
    operands += [w, b]
    in_specs += [bcast_spec(w.shape), bcast_spec((1, cout))]
    if mul is not None:
        operands.append(mul)
        in_specs.append(row_spec(cout_eff))
    if residual is not None:
        operands.append(residual)
        in_specs.append(row_spec(cout_eff))

    kernel = functools.partial(
        _fused_linear_kernel, act=act, has_ln=ln is not None,
        has_bn=bn is not None, glu=glu, has_mul=mul is not None,
        has_res=residual is not None, res_scale=res_scale)

    return pl.pallas_call(
        kernel,
        out_shape=jax.ShapeDtypeStruct((n, cout_eff), out_dtype or x2d.dtype),
        grid=grid,
        in_specs=in_specs,
        out_specs=row_spec(cout_eff),
        compiler_params=_cparams("parallel"),
    )(*operands)


# ----------------------------------------------------------------------------
# Standalone (row-tiled) LayerNorm for the block-final normalization
# ----------------------------------------------------------------------------
def _layernorm_kernel(x_ref, g_ref, b_ref, o_ref):
    x = x_ref[...].astype(jnp.float32)
    mu = jnp.mean(x, axis=-1, keepdims=True)
    var = jnp.mean(jnp.square(x - mu), axis=-1, keepdims=True)
    y = (x - mu) * jax.lax.rsqrt(var + 1e-5)
    y = y * g_ref[...].astype(jnp.float32) + b_ref[...].astype(jnp.float32)
    o_ref[...] = y.astype(o_ref.dtype)


def layernorm2d(x2d, g, b):
    n, c = x2d.shape
    blk = n if n <= ROW_BLOCK else ROW_BLOCK
    return pl.pallas_call(
        _layernorm_kernel,
        out_shape=jax.ShapeDtypeStruct((n, c), x2d.dtype),
        grid=(pl.cdiv(n, blk),),
        in_specs=[pl.BlockSpec((blk, c), lambda i: (i, 0)),
                  pl.BlockSpec((1, c), lambda i: (0, 0)),
                  pl.BlockSpec((1, c), lambda i: (0, 0))],
        out_specs=pl.BlockSpec((blk, c), lambda i: (i, 0)),
        compiler_params=_cparams("parallel"),
    )(x2d, g, b)


# ----------------------------------------------------------------------------
# Attention: one kernel invocation per batch element, all heads together
# ----------------------------------------------------------------------------
def _attn_kernel(q_ref, k_ref, v_ref, o_ref, *, scale):
    q = q_ref[0]                                   # (H, T, dh), bf16
    k = k_ref[0]
    v = v_ref[0]
    s = jnp.einsum("htd,hsd->hts", q, k,
                   preferred_element_type=jnp.float32) * scale
    s = s - jnp.max(s, axis=-1, keepdims=True)
    p = jnp.exp(s)
    # NOTE: pl.reciprocal(approx=True) is a TPU-only micro-opt; exact divide
    # keeps the kernel portable to interpret mode.
    p = p * (1.0 / jnp.sum(p, axis=-1, keepdims=True))
    o = jnp.einsum("hts,hsd->htd", p.astype(v.dtype), v,
                   preferred_element_type=jnp.float32)
    o_ref[0] = o.astype(o_ref.dtype)


def attention(q, k, v):
    # q, k, v: (B, H, T, dh)
    # TODO(synk): flash-style KV tiling for long sequences (T^2 scores fit VMEM
    # at these demo shapes).
    B, H, T, dh = q.shape
    spec = pl.BlockSpec((1, H, T, dh), lambda b: (b, 0, 0, 0))
    return pl.pallas_call(
        functools.partial(_attn_kernel, scale=1.0 / math.sqrt(dh)),
        out_shape=jax.ShapeDtypeStruct((B, H, T, dh), q.dtype),
        grid=(B,),
        in_specs=[spec, spec, spec],
        out_specs=spec,
        compiler_params=_cparams("parallel"),
    )(q, k, v)


# ----------------------------------------------------------------------------
# Depthwise conv1d over time, fused with BatchNorm statistics accumulation
# ----------------------------------------------------------------------------
def _dwconv_kernel(xp_ref, w_ref, b_ref, o_ref, s_ref, *, K, T):
    @pl.when(pl.program_id(0) == 0)
    def _():
        s_ref[...] = jnp.zeros_like(s_ref)

    xp = xp_ref[0].astype(jnp.float32)             # (T + K - 1, C)
    w = w_ref[...].astype(jnp.float32)             # (K, C)
    acc = jnp.zeros((T, xp.shape[-1]), jnp.float32)
    for k in range(K):                             # static, fully unrolled
        acc = acc + xp[k:k + T, :] * w[k:k + 1, :]
    acc = acc + b_ref[...].astype(jnp.float32)
    o_ref[0] = acc.astype(o_ref.dtype)

    # Accumulate per-channel sum / sum-of-squares for BatchNorm (training-mode
    # batch statistics) into a revisited (2, C) output block.
    sums = jnp.concatenate(
        [jnp.sum(acc, axis=0, keepdims=True),
         jnp.sum(acc * acc, axis=0, keepdims=True)], axis=0)
    s_ref[...] += sums


def depthwise_conv1d(x, w, b):
    # x: (B, T, C), w: (K, C), b: (1, C); "same" padding (odd K).
    B, T, C = x.shape
    K = w.shape[0]
    pad = (K - 1) // 2
    xp = jnp.pad(x, ((0, 0), (pad, K - 1 - pad), (0, 0)))
    Tp = T + K - 1
    conv, stats = pl.pallas_call(
        functools.partial(_dwconv_kernel, K=K, T=T),
        out_shape=(jax.ShapeDtypeStruct((B, T, C), x.dtype),
                   jax.ShapeDtypeStruct((2, C), jnp.float32)),
        grid=(B,),
        in_specs=[pl.BlockSpec((1, Tp, C), lambda bi: (bi, 0, 0)),
                  pl.BlockSpec((K, C), lambda bi: (0, 0)),
                  pl.BlockSpec((1, C), lambda bi: (0, 0))],
        out_specs=(pl.BlockSpec((1, T, C), lambda bi: (bi, 0, 0)),
                   pl.BlockSpec((2, C), lambda bi: (0, 0))),
        compiler_params=_cparams("arbitrary"),
    )(xp, w, b)
    return conv, stats


# ----------------------------------------------------------------------------
# Model modules (JAX glue: reshapes / head packing / crop logic only)
# ----------------------------------------------------------------------------
def im2col(x, k, s):
    # x: (B, H, W, C) -> (B, Ho, Wo, k*k*C)
    B, H, W, C = x.shape
    Ho = (H - k) // s + 1
    Wo = (W - k) // s + 1
    cols = []
    for i in range(k):
        for j in range(k):
            cols.append(x[:, i:i + s * (Ho - 1) + 1:s, j:j + s * (Wo - 1) + 1:s, :])
    return jnp.concatenate(cols, axis=-1), Ho, Wo


def conv2d_subsample(x, p):
    # x: (B, T, D) -> NHWC with C=1 (PyTorch does unsqueeze(1) NCHW).
    # TODO(synk): im2col is done in XLA glue; a fully fused subsampling-conv
    # Pallas kernel would avoid writing the 9x-expanded tensor to HBM.
    x = x[:, :, :, None]
    B = x.shape[0]
    cols, T1, F1 = im2col(x, 3, 2)
    y = fused_linear(cols.reshape(-1, cols.shape[-1]),
                     p["conv1_w"], p["conv1_b"], act="relu")
    y = y.reshape(B, T1, F1, -1)
    cols2, T2, F2 = im2col(y, 3, 2)
    y = fused_linear(cols2.reshape(-1, cols2.shape[-1]),
                     p["conv2_w"], p["conv2_b"], act="relu")
    y = y.reshape(B, T2, F2, -1)
    # PyTorch: (B, E, T2, F2).permute(0, 2, 1, 3).reshape(B, T2, E*F2)
    y = jnp.transpose(y, (0, 1, 3, 2)).reshape(B, T2, -1)
    return y


def encoder_forward(x, p):
    # Conformer(..., only_subsample=True): subsample -> projection -> fc.
    y = conv2d_subsample(x, p)
    B, T2 = y.shape[0], y.shape[1]
    h = fused_linear(y.reshape(B * T2, -1), p["proj_w"], p["proj_b"])
    # TODO(synk): dropout layers omitted (deterministic eval-mode forward).
    h = fused_linear(h, p["fc_w"], p["fc_b"])
    return h.reshape(B, T2, -1)


def ffn_block(x2d, p, scale):
    # x + scale * FFN(x), with LN fused into the first linear and the
    # residual add fused into the second linear.
    h = fused_linear(x2d, p["w1"], p["b1"], act="swish",
                     ln=(p["ln_g"], p["ln_b"]))
    return fused_linear(h, p["w2"], p["b2"], residual=x2d, res_scale=scale)


def mhsa_block(x2d, p, nhead, B, T):
    E = x2d.shape[-1]
    dh = E // nhead
    # Fused LN + packed QKV projection (E -> 3E) in one kernel.
    qkv = fused_linear(x2d, p["w_qkv"], p["b_qkv"], ln=(p["ln_g"], p["ln_b"]))
    qkv = qkv.reshape(B, T, 3, nhead, dh)
    q = jnp.transpose(qkv[:, :, 0], (0, 2, 1, 3))
    k = jnp.transpose(qkv[:, :, 1], (0, 2, 1, 3))
    v = jnp.transpose(qkv[:, :, 2], (0, 2, 1, 3))
    # TODO(synk): Conformer relative positional MHSA omitted (plain SDPA).
    o = attention(q, k, v)
    o = jnp.transpose(o, (0, 2, 1, 3)).reshape(B * T, E)
    return fused_linear(o, p["wo"], p["bo"], residual=x2d)


def conv_block(x2d, p, B, T):
    # LN + pointwise(2E) + GLU fused in one kernel.
    h = fused_linear(x2d, p["pw1_w"], p["pw1_b"],
                     ln=(p["ln_g"], p["ln_b"]), glu=True)
    # Depthwise conv; BN batch statistics accumulated inside the same kernel.
    conv, stats = depthwise_conv1d(h.reshape(B, T, -1), p["dw_w"], p["dw_b"])
    n = float(B * T)
    mean = stats[0] / n
    var = stats[1] / n - jnp.square(mean)
    inv = jax.lax.rsqrt(var + 1e-5)
    bn = (mean.reshape(1, -1), inv.reshape(1, -1), p["bn_g"], p["bn_b"])
    # BN-normalize + Swish fused into the second pointwise conv, residual fused.
    return fused_linear(conv.reshape(B * T, -1), p["pw2_w"], p["pw2_b"],
                        bn=bn, residual=x2d)


def conformer_block(x2d, p, nhead, B, T):
    x2d = ffn_block(x2d, p["ff1"], 0.5)
    x2d = mhsa_block(x2d, p["mhsa"], nhead, B, T)
    x2d = conv_block(x2d, p["conv"], B, T)
    x2d = ffn_block(x2d, p["ff2"], 0.5)
    return layernorm2d(x2d, p["ln_g"], p["ln_b"])


def conformer_forward(x, p, nhead):
    # Conformer(..., subsample=False): Linear(emb->E) -> blocks -> fc.
    B, T, _ = x.shape
    h = fused_linear(x.reshape(B * T, -1), p["proj_w"], p["proj_b"])
    for lp in p["layers"]:
        h = conformer_block(h, lp, nhead, B, T)
    h = fused_linear(h, p["fc_w"], p["fc_b"])
    # TODO(synk): library Conformer applies log_softmax on the fc output;
    # omitted for TS2Vec embeddings.
    return h.reshape(B, T, -1)


def take_per_row(A, indx, num_elem):
    all_indx = indx[:, None] + np.arange(num_elem)
    return A[jnp.arange(A.shape[0])[:, None], jnp.asarray(all_indx)]


def conformer_ts2vec_forward(params, wave, mask_key, np_rng, inference=False):
    # wave: (B, 3, T) -> permute(0, 2, 1) -> (B, T, 3)
    x = jnp.transpose(wave, (0, 2, 1)).astype(CDT)
    B, T, _ = x.shape
    D = params["inp_w"].shape[1]

    # generate_binomial_mask(B, T, C) with p=0.5; fused into the input
    # projection kernel as an elementwise multiply.
    # TODO(synk): per-element mask (matching the 3-arg call); classic TS2Vec
    # masks whole timesteps instead.
    keep = jax.random.bernoulli(mask_key, 0.5, (B * T, D)).astype(CDT)
    x2d = fused_linear(x.reshape(B * T, 3), params["inp_w"], params["inp_b"],
                       mul=keep)
    enc = encoder_forward(x2d.reshape(B, T, D), params["encoder"])

    if inference:
        return conformer_forward(enc, params["conformer"],
                                 params["nhead"]).astype(jnp.float32)

    # Random-crop logic (host-side numpy, as in the reference).
    ts_l = enc.shape[1]
    crop_l = int(np_rng.randint(2, ts_l + 1))
    crop_left = int(np_rng.randint(ts_l - crop_l + 1))
    crop_right = crop_left + crop_l
    crop_eleft = int(np_rng.randint(crop_left + 1))
    crop_eright = int(np_rng.randint(crop_right, ts_l + 1))
    crop_offset = np_rng.randint(-crop_eleft, ts_l - crop_eright + 1, size=B)

    w1 = take_per_row(enc, crop_offset + crop_eleft, crop_right - crop_eleft)
    w2 = take_per_row(enc, crop_offset + crop_left, crop_eright - crop_left)
    out1 = conformer_forward(w1, params["conformer"], params["nhead"])
    out2 = conformer_forward(w2, params["conformer"], params["nhead"])
    return (out1[:, -crop_l:].astype(jnp.float32),
            out2[:, :crop_l].astype(jnp.float32))


# ----------------------------------------------------------------------------
# Deterministic parameter initialization
# ----------------------------------------------------------------------------
def init_params(key, d_model, emb_dim, d_ffn, enc_layers, nhead,
                conv_kernel=31, ff_expansion=4):
    keys = iter(jax.random.split(key, 1024))

    def nrm(shape, s=0.05):
        return (s * jax.random.normal(next(keys), shape, jnp.float32)).astype(CDT)

    def nrm_f32(shape, s=0.05):
        return s * jax.random.normal(next(keys), shape, jnp.float32)

    zeros = lambda shape: jnp.zeros(shape, CDT)
    onesf = lambda shape: jnp.ones(shape, jnp.float32)
    zerosf = lambda shape: jnp.zeros(shape, jnp.float32)

    E = d_ffn
    F1 = (d_model - 3) // 2 + 1
    F2 = (F1 - 3) // 2 + 1

    def ff_p():
        return dict(ln_g=onesf((1, E)), ln_b=zerosf((1, E)),
                    w1=nrm((E, ff_expansion * E)), b1=zeros((1, ff_expansion * E)),
                    w2=nrm((ff_expansion * E, E)), b2=zeros((1, E)))

    def mhsa_p():
        return dict(ln_g=onesf((1, E)), ln_b=zerosf((1, E)),
                    w_qkv=nrm((E, 3 * E)), b_qkv=zeros((1, 3 * E)),
                    wo=nrm((E, E)), bo=zeros((1, E)))

    def conv_p():
        return dict(ln_g=onesf((1, E)), ln_b=zerosf((1, E)),
                    pw1_w=nrm((E, 2 * E)), pw1_b=zeros((1, 2 * E)),
                    dw_w=nrm_f32((conv_kernel, E)), dw_b=zerosf((1, E)),
                    bn_g=onesf((1, E)), bn_b=zerosf((1, E)),
                    pw2_w=nrm((E, E)), pw2_b=zeros((1, E)))

    return dict(
        nhead=nhead,
        inp_w=nrm((3, d_model)), inp_b=zeros((1, d_model)),
        encoder=dict(
            conv1_w=nrm((9, E)), conv1_b=zeros((1, E)),
            conv2_w=nrm((9 * E, E)), conv2_b=zeros((1, E)),
            proj_w=nrm((E * F2, E)), proj_b=zeros((1, E)),
            fc_w=nrm((E, emb_dim)), fc_b=zeros((1, emb_dim)),
        ),
        conformer=dict(
            proj_w=nrm((emb_dim, E)), proj_b=zeros((1, E)),
            layers=[dict(ff1=ff_p(), mhsa=mhsa_p(), conv=conv_p(), ff2=ff_p(),
                         ln_g=onesf((1, E)), ln_b=zerosf((1, E)))
                    for _ in range(enc_layers)],
            fc_w=nrm((E, emb_dim)), fc_b=zeros((1, emb_dim)),
        ),
    )


if __name__ == "__main__":
    d_model, emb_dim, d_ffn, enc_layers, nhead = 32, 16, 32, 1, 2
    B, T = 2, 32

    key = jax.random.PRNGKey(0)
    pkey, xkey, mkey = jax.random.split(key, 3)
    params = init_params(pkey, d_model, emb_dim, d_ffn, enc_layers, nhead)
    # matches nn.Linear(3, d_model) applied after permute(0, 2, 1)
    wave = jax.random.normal(xkey, (B, 3, T), jnp.float32)

    np_rng = np.random.RandomState(0)
    out1, out2 = conformer_ts2vec_forward(params, wave, mask_key=mkey,
                                          np_rng=np_rng, inference=False)
    jax.block_until_ready(out1)
    jax.block_until_ready(out2)

    assert out1.shape == out2.shape and out1.shape[0] == B and out1.shape[-1] == emb_dim
    assert bool(jnp.all(jnp.isfinite(out1))) and bool(jnp.all(jnp.isfinite(out2)))
    print("KERNEL_OK")
</pallas_src>

<mosaic_0001>
module attributes {stable_mosaic.version = 11 : i64} {
  func.func @_fused_linear_kernel(%arg0: i32, %arg1: memref<64x3xbf16, #tpu.memory_space<vmem>>, %arg2: memref<3x32xbf16, #tpu.memory_space<vmem>>, %arg3: memref<1x32xbf16, #tpu.memory_space<vmem>>, %arg4: memref<64x32xbf16, #tpu.memory_space<vmem>>, %arg5: memref<64x32xbf16, #tpu.memory_space<vmem>>) attributes {dimension_semantics = [#tpu.dimension_semantics<parallel>], iteration_bounds = array<i64: 1>, scalar_prefetch = 0 : i64, scratch_operands = 0 : i64, tpu.core_type = #tpu.core_type<tc>, window_params = [{transform_indices = @transform_0, window_bounds = array<i64: 64, 3>}, {pipeline_mode = #tpu.pipeline_mode<synchronous>, transform_indices = @transform_1, window_bounds = array<i64: 3, 32>}, {pipeline_mode = #tpu.pipeline_mode<synchronous>, transform_indices = @transform_2, window_bounds = array<i64: 1, 32>}, {transform_indices = @transform_3, window_bounds = array<i64: 64, 32>}, {transform_indices = @transform_4, window_bounds = array<i64: 64, 32>}]} {
    %c0 = arith.constant 0 : index
    %c0_0 = arith.constant 0 : index
    %0 = vector.load %arg1[%c0, %c0_0] : memref<64x3xbf16, #tpu.memory_space<vmem>>, vector<64x3xbf16>
    %1 = arith.extf %0 : vector<64x3xbf16> to vector<64x3xf32>
    %c0_1 = arith.constant 0 : index
    %c0_2 = arith.constant 0 : index
    %2 = vector.load %arg3[%c0_1, %c0_2] : memref<1x32xbf16, #tpu.memory_space<vmem>>, vector<1x32xbf16>
    %3 = arith.extf %2 : vector<1x32xbf16> to vector<1x32xf32>
    %4 = arith.truncf %1 : vector<64x3xf32> to vector<64x3xbf16>
    %c0_3 = arith.constant 0 : index
    %c0_4 = arith.constant 0 : index
    %5 = vector.load %arg2[%c0_3, %c0_4] : memref<3x32xbf16, #tpu.memory_space<vmem>>, vector<3x32xbf16>
    %cst = arith.constant dense<0.000000e+00> : vector<64x32xf32>
    %6 = tpu.matmul %4, %5, %cst {dimension_numbers = #tpu.dot_dimension_numbers<[1], [0], [0], [1], [0, 0, 1, 1], [], []>} : vector<64x3xbf16>, vector<3x32xbf16>, vector<64x32xf32> -> vector<64x32xf32>
    %7 = vector.broadcast %3 : vector<1x32xf32> to vector<64x32xf32>
    %8 = arith.addf %6, %7 : vector<64x32xf32>
    %c0_5 = arith.constant 0 : index
    %c0_6 = arith.constant 0 : index
    %9 = vector.load %arg4[%c0_5, %c0_6] : memref<64x32xbf16, #tpu.memory_space<vmem>>, vector<64x32xbf16>
    %10 = arith.extf %9 : vector<64x32xbf16> to vector<64x32xf32>
    %11 = arith.mulf %8, %10 : vector<64x32xf32>
    %12 = arith.truncf %11 : vector<64x32xf32> to vector<64x32xbf16>
    %c0_7 = arith.constant 0 : index
    %c0_8 = arith.constant 0 : index
    %13 = vector.load %arg5[%c0_7, %c0_8] : memref<64x32xbf16, #tpu.memory_space<vmem>>, vector<64x32xbf16>
    tpu.vector_store %arg5[%c0_7, %c0_8], %12 {strides = array<i32>} : memref<64x32xbf16, #tpu.memory_space<vmem>>, vector<64x32xbf16>,
    return
  }
  func.func @transform_0(%arg0: i32) -> (i32, i32) {
    %c0_i32 = arith.constant 0 : i32
    %c0_i32_0 = arith.constant 0 : i32
    return %arg0, %c0_i32 : i32, i32
  }
  func.func @transform_1(%arg0: i32) -> (i32, i32) {
    %c0_i32 = arith.constant 0 : i32
    %c0_i32_0 = arith.constant 0 : i32
    %c0_i32_1 = arith.constant 0 : i32
    return %c0_i32, %c0_i32_0 : i32, i32
  }
  func.func @transform_2(%arg0: i32) -> (i32, i32) {
    %c0_i32 = arith.constant 0 : i32
    %c0_i32_0 = arith.constant 0 : i32
    %c0_i32_1 = arith.constant 0 : i32
    return %c0_i32, %c0_i32_0 : i32, i32
  }
  func.func @transform_3(%arg0: i32) -> (i32, i32) {
    %c0_i32 = arith.constant 0 : i32
    %c0_i32_0 = arith.constant 0 : i32
    return %arg0, %c0_i32 : i32, i32
  }
  func.func @transform_4(%arg0: i32) -> (i32, i32) {
    %c0_i32 = arith.constant 0 : i32
    %c0_i32_0 = arith.constant 0 : i32
    return %arg0, %c0_i32 : i32, i32
  }
}

</mosaic_0001>

<bundles_post_ra>
// kernel: tpu_custom_call.1
= control target key start
LH: loop header
LB: loop body
LE: loop exit
PB: predicated region body
PF: predicated region fallthrough
CT: control target
= control target key end

     0   :  { %vm66_vm0 = vcmask 1040384   ;;  %vm67_vm1 = vcmask 1041408   ;;  %vm53_vm2 = vcmask 23552   ;;  %v272_v1 = vmov 65535   ;;  %s364_s1 = inlined_call_operand.vmem [shape: bf16[3,32], index: 1, kind: input, shape index: {}]   ;;  %s365_s0 = inlined_call_operand.vmem [shape: bf16[64,3], index: 0, kind: input, shape index: {}]   ;;  %s366_s2 = inlined_call_operand.vmem [shape: bf16[1,32], index: 2, kind: input, shape index: {}]   ;;  %s367_s3 = inlined_call_operand.vmem [shape: bf16[64,32], index: 3, kind: input, shape index: {}]   ;;  %s368_s4 = inlined_call_operand.vmem [shape: bf16[64,32], index: 4, kind: output, shape index: {}]  }
   0x1   :  { %v28_v0 = vld [vmem:[%s364_s1] sm:$0x3]  ;;  %v68_v2 = vsel %vm66_vm0, 4294967295, %v272_v1  ;;  %v269_v5 = vld [vmem:[%s365_s0 + $0x10] sm:$0xff]   ;;  %v270_v7 = vld [vmem:[%s365_s0 + $0x8] sm:$0xff]   ;;  %v29_v9 = vlaneseq  ;;  %vm194_vm3 = vcmask 257024  }
   0x2   :  { %v268_v3 = vld [vmem:[%s365_s0] sm:$0xff]   ;;  %v69_v4 = vsel %vm67_vm1, %v68_v2, 0  ;;  %261 = vmatprep.mubr.msk.bf16.mxu1 %vm53_vm2, %v269_v5  ;;  %v271_v8 = vld [vmem:[%s365_s0 + $0x18] sm:$0xff]   ;;  %v247_v14 = vld [vmem:[%s367_s3 + $0x8] sm:$0xff]  }
   0x3   :  { %v71_v6 = vand.u32 %v69_v4, %v28_v0  ;;  %257 = vmatprep.mubr.msk.bf16.mxu0 %vm53_vm2, %v268_v3  ;;  %v30_v10 = vshrl.u32 %v29_v9, 7  ;;  %v26_v11 = vld [vmem:[%s366_s2] sm:$0x1]  ;;  %v249_v15 = vld [vmem:[%s367_s3 + $0x18] sm:$0xff]   ;;  %v248_v18 = vld [vmem:[%s367_s3 + $0x10] sm:$0xff]   ;;  %v237_v19 = vunpack.c.l.bf16 %v247_v14  ;;  %v238_v34 = vunpack.c.h.bf16 %v247_v14 }
   0x4   :  { %v27_v12 = vunpack.c.l.bf16 %v26_v11  ;;  %v232_v17 = vld [vmem:[%s367_s3] sm:$0xff]   ;;  %v245_v20 = vunpack.c.l.bf16 %v249_v15  ;;  %v241_v26 = vunpack.c.l.bf16 %v248_v18  ;;  %v246_v36 = vunpack.c.h.bf16 %v249_v15 }
   0x5   :  { %255 = vmatprep.subr.bf16.mxu0 %v71_v6  ;;  %265 = vmatprep.subr.bf16.mxu1 %v71_v6  ;;  %v31_v13 = vsub.s32 0, %v30_v10  ;;  %v233_v25 = vunpack.c.l.bf16 %v232_v17  ;;  %v234_v37 = vunpack.c.h.bf16 %v232_v17  ;;  %v242_v38 = vunpack.c.h.bf16 %v248_v18 }
   0x6   :  { %256 = vmatpush3.bf16.msra.mxu0 %v71_v6  ;;  %266 = vmatpush3.bf16.msra.mxu1 %v71_v6 }
   0x7   :  { %v32_v16 = vrot.slane %v27_v12, %v31_v13 }
   0x9   :  { %258 = vmatmul.mubr.msk.bf16.vlgmr.msra.gmra.mxu0 %vm53_vm2, %v270_v7  ;;  %262 = vmatmul.mubr.msk.bf16.vlgmr.msra.gmra.mxu1 %vm53_vm2, %v271_v8 }
  0xc9   :  { %v259_v21 = vpop.f32.mrf.mxu0  ;;  %v263_v22 = vpop.f32.mrf.mxu1 }
  0xca   :  { %v116_v23 = vadd.f32 %v259_v21, %v32_v16  ;;  %v132_v24 = vadd.f32 %v263_v22, %v32_v16 }
  0xcb   :  { %v107_v27 = vpop.f32.mrf.mxu0  ;;  %v123_v28 = vpop.f32.mrf.mxu1 }
  0xcc   :  { %v156_v29 = vmul.f32 %v237_v19, %v116_v23  ;;  %v160_v30 = vmul.f32 %v245_v20, %v132_v24  ;;  %v108_v31 = vadd.f32 %v107_v27, %v32_v16  ;;  %v124_v32 = vadd.f32 %v123_v28, %v32_v16 }
  0xcd   :  { %v260_v33 = vpop.f32.mrf.mxu0  ;;  %v264_v35 = vpop.f32.mrf.mxu1 }
  0xce   :  { %v225_v39 = vpack.c.bf16 %v156_v29, %v156_v29  ;;  %v229_v40 = vpack.c.bf16 %v160_v30, %v160_v30  ;;  %v154_v41 = vmul.f32 %v233_v25, %v108_v31  ;;  %v158_v42 = vmul.f32 %v241_v26, %v124_v32 }
  0xcf   :  { %v119_v43 = vadd.f32 %v260_v33, %v32_v16  ;;  %v135_v44 = vadd.f32 %v264_v35, %v32_v16  ;;  %v110_v45 = vpop.f32.mrf.mxu0  ;;  %v126_v46 = vpop.f32.mrf.mxu1 }
  0xd0   :  { %197 = vst.msk [vmem:[%s368_s4 + $0x8] sm:$0xf] %vm194_vm3, %v225_v39  ;;  %201 = vst.msk [vmem:[%s368_s4 + $0x18] sm:$0xf] %vm194_vm3, %v229_v40  ;;  %v223_v47 = vpack.c.bf16 %v154_v41, %v154_v41  ;;  %v227_v48 = vpack.c.bf16 %v158_v42, %v158_v42  ;;  %v111_v49 = vadd.f32 %v110_v45, %v32_v16 }
  0xd1   :  { %v127_v50 = vadd.f32 %v126_v46, %v32_v16  ;;  %v157_v51 = vmul.f32 %v238_v34, %v119_v43  ;;  %v161_v52 = vmul.f32 %v246_v36, %v135_v44 }
  0xd2   :  { %195 = vst.msk [vmem:[%s368_s4] sm:$0xf] %vm194_vm3, %v223_v47  ;;  %199 = vst.msk [vmem:[%s368_s4 + $0x10] sm:$0xf] %vm194_vm3, %v227_v48  ;;  %v155_v53 = vmul.f32 %v234_v37, %v111_v49 }
  0xd3   :  { %v159_v54 = vmul.f32 %v242_v38, %v127_v50  ;;  %v226_v55 = vpack.c.bf16 %v157_v51, %v157_v51  ;;  %v230_v56 = vpack.c.bf16 %v161_v52, %v161_v52 }
  0xd4   :  { %v224_v57 = vpack.c.bf16 %v155_v53, %v155_v53 }
  0xd5   :  { %v228_v58 = vpack.c.bf16 %v159_v54, %v159_v54  ;;  %198 = vst.msk [vmem:[%s368_s4 + $0xc] sm:$0xf] %vm194_vm3, %v226_v55  ;;  %202 = vst.msk [vmem:[%s368_s4 + $0x1c] sm:$0xf] %vm194_vm3, %v230_v56 }
  0xd6   :  { %196 = vst.msk [vmem:[%s368_s4 + $0x4] sm:$0xf] %vm194_vm3, %v224_v57 }
  0xd7   :  { %200 = vst.msk [vmem:[%s368_s4 + $0x14] sm:$0xf] %vm194_vm3, %v228_v58 }

</bundles_post_ra>
